<compile_context>
chip_gen: v5e
topology: v5e:2x2
jax: 0.10.0
libtpu: 0.0.40
codegen_flags: <defaults>
</compile_context>

<pallas_src>
import functools

import jax
import jax.numpy as jnp
from jax import lax
from jax.experimental import pallas as pl
from jax.experimental.pallas import tpu as pltpu


def _ce_kernel(preds_ref, tgts_ref, out_ref, m_ref, l_ref, p_ref,
               *, n_rows, n_cls, tn, tc):
    i = pl.program_id(0)          # row-tile index   ("parallel")
    j = pl.program_id(1)          # class-tile index ("arbitrary", reduction)
    nj = pl.num_programs(1)

    # ---- init online-logsumexp carries at the first class tile -----------
    @pl.when(j == 0)
    def _():
        m_ref[...] = jnp.full_like(m_ref, -jnp.inf)   # running row max
        l_ref[...] = jnp.zeros_like(l_ref)            # running sum(exp(x - m))
        p_ref[...] = jnp.zeros_like(p_ref)            # picked target logit

    x_nat = preds_ref[...]                            # (tn, tc) native dtype
    x = x_nat.astype(jnp.float32)                     # f32 for exp/accumulate
    t = tgts_ref[...]                                 # (tn, 1) int32 class ids

    # Lane-local class index within this tile (shared by mask & target pick).
    lane = lax.broadcasted_iota(jnp.int32, (tn, tc), 1)
    t_local = t - j * tc                              # (tn, 1) per-row scalar

    # ---- tile max (static gate on the column-mask path) -------------------
    if (n_cls % tc) != 0:
        # Last class tile is padded: mask padded lanes with -inf before the
        # reduce.  `rem >= tc` for every tile but the last, so this is only
        # "live" on the final tile, but the code is uniform.
        rem = n_cls - j * tc                          # scalar valid-lane count
        xm = jnp.where(lane < rem, x, -jnp.inf)
        tile_max = jnp.max(xm, axis=-1, keepdims=True)
        e_src = xm
    else:
        # Full tiles: no masking at all; reduce in the native dtype (bf16
        # vregs on v6e/v7x), convert the (tn, 1) result to f32.
        tile_max = jnp.max(x_nat, axis=-1, keepdims=True).astype(jnp.float32)
        e_src = x

    # ---- online logsumexp update ------------------------------------------
    m_prev = m_ref[...]
    m_new = jnp.maximum(m_prev, tile_max)
    alpha = jnp.exp(m_prev - m_new)                   # (tn, 1), EUP
    e = jnp.exp(e_src - m_new)                        # padded cols -> exp(-inf)=0
    l_ref[...] = alpha * l_ref[...] + jnp.sum(e, axis=-1, keepdims=True)
    m_ref[...] = m_new

    # ---- accumulate the target logit (one class tile hits per row) --------
    hit = lane == t_local
    p_ref[...] += jnp.sum(jnp.where(hit, x, 0.0), axis=-1, keepdims=True)

    # ---- finalize: per-row NLL, mask padded rows, emit tile partial sum ----
    @pl.when(j == nj - 1)
    def _():
        per_row = (m_ref[...] + jnp.log(l_ref[...])) - p_ref[...]   # (tn, 1)
        if (n_rows % tn) != 0:                        # static gate
            row = i * tn + lax.broadcasted_iota(jnp.int32, (tn, 1), 0)
            per_row = jnp.where(row < n_rows, per_row, 0.0)
        partial = jnp.sum(per_row)                    # scalar
        sub = lax.broadcasted_iota(jnp.int32, (8, 128), 0)
        lane8 = lax.broadcasted_iota(jnp.int32, (8, 128), 1)
        out_ref[...] = jnp.where((sub == 0) & (lane8 == 0), partial, 0.0)


def _round_down(x, m):
    return (x // m) * m


def _pick_class_tile(C, tc_max):
    """Largest legal class tile <= tc_max, preferring one that divides C."""
    if C <= tc_max:
        return C                                      # full-extent block
    top = _round_down(tc_max, 128)
    cand = top
    while cand >= 128:
        if C % cand == 0:
            return cand                               # masking statically dead
        cand -= 128
    return max(128, top)                              # fall back: masked last tile


def _pick_row_tile(N, tn_max):
    """Row tile: multiple of 16 (bf16 packing) when tiled; >=2 tiles if big."""
    if N <= tn_max:
        if N >= 256 and N % 32 == 0:
            return N // 2                             # megacore: >= 2 row tiles
        return N                                      # full-extent block
    tn = _round_down(tn_max, 16)
    if tn == 0:
        tn = _round_down(tn_max, 8)
    return max(8, tn)


def ce_loss(preds, tgts, *, tn_max=256, tc_max=4096):
    """CrossEntropyLoss(preds, tgts) with mean reduction.

    preds: (N, C) float logits (any float dtype; math is done in f32)
    tgts:  (N,)   integer class indices in [0, C)
    """
    N, C = preds.shape
    TN = _pick_row_tile(N, tn_max)
    TC = _pick_class_tile(C, tc_max)
    nt = (N + TN - 1) // TN
    nc = (C + TC - 1) // TC

    tgts2d = tgts.astype(jnp.int32).reshape(N, 1)

    kernel = functools.partial(_ce_kernel, n_rows=N, n_cls=C, tn=TN, tc=TC)

    # VMEM budget: double-buffered preds tile dominates; stay well under the
    # 64 MiB physical VMEM of v7x (128 MiB on v5e/v6e).
    itemsize = preds.dtype.itemsize
    vmem_needed = (2 * TN * TC * itemsize          # preds (double-buffered)
                   + 2 * TN * 128 * 4              # tgts (lane-padded)
                   + 3 * TN * 128 * 4              # scratch carries (lane-padded)
                   + 2 * 8 * 128 * 4)              # partial-sum output
    vmem_limit = int(min(64 * 1024 * 1024, max(32 * 1024 * 1024, 2 * vmem_needed)))

    partials = pl.pallas_call(
        kernel,
        out_shape=jax.ShapeDtypeStruct((nt * 8, 128), jnp.float32),
        grid_spec=pltpu.PrefetchScalarGridSpec(
            num_scalar_prefetch=0,
            grid=(nt, nc),
            in_specs=[
                # TODO(synk): on v5e, if profiling shows exposed DMA, add
                # pipeline_mode=pl.Buffered(3) here.
                pl.BlockSpec((TN, TC), lambda i, j: (i, j)),
                pl.BlockSpec((TN, 1), lambda i, j: (i, 0)),
            ],
            out_specs=pl.BlockSpec((8, 128), lambda i, j: (i, 0)),
            scratch_shapes=[
                pltpu.VMEM((TN, 1), jnp.float32),   # running max
                pltpu.VMEM((TN, 1), jnp.float32),   # running sum(exp)
                pltpu.VMEM((TN, 1), jnp.float32),   # picked target logit
            ],
        ),
        compiler_params=pltpu.CompilerParams(
            dimension_semantics=("parallel", "arbitrary"),
            vmem_limit_bytes=vmem_limit,
        ),
        cost_estimate=pl.CostEstimate(
            flops=5 * N * C,
            transcendentals=N * C,
            bytes_accessed=N * C * itemsize + N * 4 + nt * 8 * 128 * 4,
        ),
    )(preds, tgts2d)

    # Tiny final reduction + mean in the wrapper (divide by N exactly once).
    return jnp.sum(partials) / jnp.float32(N)


def _ref_loss(preds, tgts):
    N = preds.shape[0]
    p32 = preds.astype(jnp.float32)
    return jnp.mean(
        jax.scipy.special.logsumexp(p32, axis=-1) - p32[jnp.arange(N), tgts]
    )


if __name__ == "__main__":
    key = jax.random.PRNGKey(0)
    k1, k2, k3, k4, k5, k6 = jax.random.split(key, 6)

    # ---- test 1: small shapes, single tile (full-extent blocks) ----------
    N1, C1 = 8, 32
    preds1 = jax.random.normal(k1, (N1, C1), dtype=jnp.float32)
    tgts1 = jax.random.randint(k2, (N1,), 0, C1, dtype=jnp.int32)
    loss1 = ce_loss(preds1, tgts1)
    jax.block_until_ready(loss1)
    ref1 = _ref_loss(preds1, tgts1)
    assert jnp.allclose(loss1, ref1, atol=1e-5, rtol=1e-5), (loss1, ref1)

    # ---- test 2: row/class tiling + partial-tile masking (f32) -----------
    N2, C2 = 20, 200
    preds2 = jax.random.normal(k3, (N2, C2), dtype=jnp.float32)
    tgts2 = jax.random.randint(k4, (N2,), 0, C2, dtype=jnp.int32)
    loss2 = ce_loss(preds2, tgts2, tn_max=8, tc_max=128)
    jax.block_until_ready(loss2)
    ref2 = _ref_loss(preds2, tgts2)
    assert jnp.allclose(loss2, ref2, atol=1e-5, rtol=1e-5), (loss2, ref2)

    # ---- test 3: bf16 inputs, class tile divides C (mask-free hot path) --
    N3, C3 = 32, 512
    preds3 = jax.random.normal(k5, (N3, C3), dtype=jnp.bfloat16)
    tgts3 = jax.random.randint(k6, (N3,), 0, C3, dtype=jnp.int32)
    loss3 = ce_loss(preds3, tgts3, tn_max=16, tc_max=256)
    jax.block_until_ready(loss3)
    ref3 = _ref_loss(preds3, tgts3)
    assert jnp.allclose(loss3, ref3, atol=1e-4, rtol=1e-4), (loss3, ref3)

    print("KERNEL_OK")
</pallas_src>

<mosaic_0001>
module attributes {stable_mosaic.version = 11 : i64} {
  func.func @_ce_kernel(%arg0: i32, %arg1: i32, %arg2: memref<8x32xf32, #tpu.memory_space<vmem>>, %arg3: memref<8x1xi32, #tpu.memory_space<vmem>>, %arg4: memref<8x128xf32, #tpu.memory_space<vmem>>, %arg5: memref<8x1xf32, #tpu.memory_space<vmem>>, %arg6: memref<8x1xf32, #tpu.memory_space<vmem>>, %arg7: memref<8x1xf32, #tpu.memory_space<vmem>>) attributes {dimension_semantics = [#tpu.dimension_semantics<parallel>, #tpu.dimension_semantics<arbitrary>], iteration_bounds = array<i64: 1, 1>, scalar_prefetch = 0 : i64, scratch_operands = 3 : i64, tpu.core_type = #tpu.core_type<tc>, window_params = [{transform_indices = @transform_0, window_bounds = array<i64: 8, 32>}, {transform_indices = @transform_1, window_bounds = array<i64: 8, 1>}, {transform_indices = @transform_2, window_bounds = array<i64: 8, 128>}]} {
    %c0_i32 = arith.constant 0 : i32
    %0 = arith.cmpi eq, %arg1, %c0_i32 : i32
    %1 = arith.extui %0 : i1 to i32
    %c0_i32_0 = arith.constant 0 : i32
    %2 = arith.cmpi ne, %1, %c0_i32_0 : i32
    scf.if %2 {
      %cst_21 = arith.constant 0xFF800000 : f32
      %37 = vector.broadcast %cst_21 : f32 to vector<8x1xf32>
      %c0_22 = arith.constant 0 : index
      %c0_23 = arith.constant 0 : index
      %38 = vector.load %arg5[%c0_22, %c0_23] : memref<8x1xf32, #tpu.memory_space<vmem>>, vector<8x1xf32>
      tpu.vector_store %arg5[%c0_22, %c0_23], %37 {strides = array<i32>} : memref<8x1xf32, #tpu.memory_space<vmem>>, vector<8x1xf32>,
      %cst_24 = arith.constant 0.000000e+00 : f32
      %39 = vector.broadcast %cst_24 : f32 to vector<8x1xf32>
      %c0_25 = arith.constant 0 : index
      %c0_26 = arith.constant 0 : index
      %40 = vector.load %arg6[%c0_25, %c0_26] : memref<8x1xf32, #tpu.memory_space<vmem>>, vector<8x1xf32>
      tpu.vector_store %arg6[%c0_25, %c0_26], %39 {strides = array<i32>} : memref<8x1xf32, #tpu.memory_space<vmem>>, vector<8x1xf32>,
      %cst_27 = arith.constant 0.000000e+00 : f32
      %41 = vector.broadcast %cst_27 : f32 to vector<8x1xf32>
      %c0_28 = arith.constant 0 : index
      %c0_29 = arith.constant 0 : index
      %42 = vector.load %arg7[%c0_28, %c0_29] : memref<8x1xf32, #tpu.memory_space<vmem>>, vector<8x1xf32>
      tpu.vector_store %arg7[%c0_28, %c0_29], %41 {strides = array<i32>} : memref<8x1xf32, #tpu.memory_space<vmem>>, vector<8x1xf32>,
    } else {
    }
    %c0 = arith.constant 0 : index
    %c0_1 = arith.constant 0 : index
    %3 = vector.load %arg2[%c0, %c0_1] : memref<8x32xf32, #tpu.memory_space<vmem>>, vector<8x32xf32>
    %c0_2 = arith.constant 0 : index
    %c0_3 = arith.constant 0 : index
    %4 = vector.load %arg3[%c0_2, %c0_3] : memref<8x1xi32, #tpu.memory_space<vmem>>, vector<8x1xi32>
    %5 = tpu.iota {dimensions = array<i32: 1>} : vector<8x32xi32>
    %c32_i32 = arith.constant 32 : i32
    %6 = arith.muli %arg1, %c32_i32 : i32
    %7 = vector.broadcast %6 : i32 to vector<8x1xi32>
    %8 = arith.subi %4, %7 : vector<8x1xi32>
    %cst = arith.constant dense<0xFF800000> : vector<8xf32>
    %9 = vector.multi_reduction <maximumf>, %3, %cst [1] : vector<8x32xf32> to vector<8xf32>
    %10 = vector.shape_cast %9 : vector<8xf32> to vector<8x1xf32>
    %c0_4 = arith.constant 0 : index
    %c0_5 = arith.constant 0 : index
    %11 = vector.load %arg5[%c0_4, %c0_5] : memref<8x1xf32, #tpu.memory_space<vmem>>, vector<8x1xf32>
    %12 = arith.maximumf %11, %10 : vector<8x1xf32>
    %13 = arith.subf %11, %12 : vector<8x1xf32>
    %14 = math.exp %13 : vector<8x1xf32>
    %15 = vector.broadcast %12 : vector<8x1xf32> to vector<8x32xf32>
    %16 = arith.subf %3, %15 : vector<8x32xf32>
    %17 = math.exp %16 : vector<8x32xf32>
    %c0_6 = arith.constant 0 : index
    %c0_7 = arith.constant 0 : index
    %18 = vector.load %arg6[%c0_6, %c0_7] : memref<8x1xf32, #tpu.memory_space<vmem>>, vector<8x1xf32>
    %19 = arith.mulf %14, %18 : vector<8x1xf32>
    %cst_8 = arith.constant dense<0.000000e+00> : vector<8xf32>
    %20 = vector.multi_reduction <add>, %17, %cst_8 [1] : vector<8x32xf32> to vector<8xf32>
    %21 = vector.shape_cast %20 : vector<8xf32> to vector<8x1xf32>
    %22 = arith.addf %19, %21 : vector<8x1xf32>
    %c0_9 = arith.constant 0 : index
    %c0_10 = arith.constant 0 : index
    %23 = vector.load %arg6[%c0_9, %c0_10] : memref<8x1xf32, #tpu.memory_space<vmem>>, vector<8x1xf32>
    tpu.vector_store %arg6[%c0_9, %c0_10], %22 {strides = array<i32>} : memref<8x1xf32, #tpu.memory_space<vmem>>, vector<8x1xf32>,
    %c0_11 = arith.constant 0 : index
    %c0_12 = arith.constant 0 : index
    %24 = vector.load %arg5[%c0_11, %c0_12] : memref<8x1xf32, #tpu.memory_space<vmem>>, vector<8x1xf32>
    tpu.vector_store %arg5[%c0_11, %c0_12], %12 {strides = array<i32>} : memref<8x1xf32, #tpu.memory_space<vmem>>, vector<8x1xf32>,
    %25 = vector.broadcast %8 : vector<8x1xi32> to vector<8x32xi32>
    %26 = arith.cmpi eq, %5, %25 : vector<8x32xi32>
    %c0_13 = arith.constant 0 : index
    %c0_14 = arith.constant 0 : index
    %27 = vector.load %arg7[%c0_13, %c0_14] : memref<8x1xf32, #tpu.memory_space<vmem>>, vector<8x1xf32>
    %cst_15 = arith.constant 0.000000e+00 : f32
    %28 = vector.broadcast %cst_15 : f32 to vector<8x32xf32>
    %29 = arith.select %26, %3, %28 : vector<8x32xi1>, vector<8x32xf32>
    %cst_16 = arith.constant dense<0.000000e+00> : vector<8xf32>
    %30 = vector.multi_reduction <add>, %29, %cst_16 [1] : vector<8x32xf32> to vector<8xf32>
    %31 = vector.shape_cast %30 : vector<8xf32> to vector<8x1xf32>
    %32 = arith.addf %27, %31 : vector<8x1xf32>
    %c0_17 = arith.constant 0 : index
    %c0_18 = arith.constant 0 : index
    %33 = vector.load %arg7[%c0_17, %c0_18] : memref<8x1xf32, #tpu.memory_space<vmem>>, vector<8x1xf32>
    tpu.vector_store %arg7[%c0_17, %c0_18], %32 {strides = array<i32>} : memref<8x1xf32, #tpu.memory_space<vmem>>, vector<8x1xf32>,
    %c0_i32_19 = arith.constant 0 : i32
    %34 = arith.cmpi eq, %arg1, %c0_i32_19 : i32
    %35 = arith.extui %34 : i1 to i32
    %c0_i32_20 = arith.constant 0 : i32
    %36 = arith.cmpi ne, %35, %c0_i32_20 : i32
    scf.if %36 {
      %c0_21 = arith.constant 0 : index
      %c0_22 = arith.constant 0 : index
      %37 = vector.load %arg5[%c0_21, %c0_22] : memref<8x1xf32, #tpu.memory_space<vmem>>, vector<8x1xf32>
      %c0_23 = arith.constant 0 : index
      %c0_24 = arith.constant 0 : index
      %38 = vector.load %arg6[%c0_23, %c0_24] : memref<8x1xf32, #tpu.memory_space<vmem>>, vector<8x1xf32>
      %39 = math.log %38 : vector<8x1xf32>
      %40 = arith.addf %37, %39 : vector<8x1xf32>
      %c0_25 = arith.constant 0 : index
      %c0_26 = arith.constant 0 : index
      %41 = vector.load %arg7[%c0_25, %c0_26] : memref<8x1xf32, #tpu.memory_space<vmem>>, vector<8x1xf32>
      %42 = arith.subf %40, %41 : vector<8x1xf32>
      %43 = vector.shape_cast %42 : vector<8x1xf32> to vector<1x8x1xf32>
      %cst_27 = arith.constant dense<0.000000e+00> : vector<1xf32>
      %44 = vector.multi_reduction <add>, %43, %cst_27 [1, 2] : vector<1x8x1xf32> to vector<1xf32>
      %45 = vector.shape_cast %44 : vector<1xf32> to vector<1x1x1xf32>
      %46 = vector.extract %45[0, 0, 0] : f32 from vector<1x1x1xf32>
      %47 = tpu.iota {dimensions = array<i32: 0>} : vector<8x128xi32>
      %48 = tpu.iota {dimensions = array<i32: 1>} : vector<8x128xi32>
      %c0_i32_28 = arith.constant 0 : i32
      %49 = vector.broadcast %c0_i32_28 : i32 to vector<8x128xi32>
      %50 = arith.cmpi eq, %47, %49 : vector<8x128xi32>
      %c0_i32_29 = arith.constant 0 : i32
      %51 = vector.broadcast %c0_i32_29 : i32 to vector<8x128xi32>
      %52 = arith.cmpi eq, %48, %51 : vector<8x128xi32>
      %53 = arith.andi %50, %52 : vector<8x128xi1>
      %cst_30 = arith.constant 0.000000e+00 : f32
      %54 = vector.broadcast %46 : f32 to vector<8x128xf32>
      %55 = vector.broadcast %cst_30 : f32 to vector<8x128xf32>
      %56 = arith.select %53, %54, %55 : vector<8x128xi1>, vector<8x128xf32>
      %c0_31 = arith.constant 0 : index
      %c0_32 = arith.constant 0 : index
      %57 = vector.load %arg4[%c0_31, %c0_32] : memref<8x128xf32, #tpu.memory_space<vmem>>, vector<8x128xf32>
      tpu.vector_store %arg4[%c0_31, %c0_32], %56 {strides = array<i32>} : memref<8x128xf32, #tpu.memory_space<vmem>>, vector<8x128xf32>,
    } else {
    }
    return
  }
  func.func @transform_0(%arg0: i32, %arg1: i32) -> (i32, i32) {
    %c0_i32 = arith.constant 0 : i32
    return %arg0, %arg1 : i32, i32
  }
  func.func @transform_1(%arg0: i32, %arg1: i32) -> (i32, i32) {
    %c0_i32 = arith.constant 0 : i32
    %c0_i32_0 = arith.constant 0 : i32
    return %arg0, %c0_i32 : i32, i32
  }
  func.func @transform_2(%arg0: i32, %arg1: i32) -> (i32, i32) {
    %c0_i32 = arith.constant 0 : i32
    %c0_i32_0 = arith.constant 0 : i32
    return %arg0, %c0_i32 : i32, i32
  }
}

</mosaic_0001>

<bundles_post_ra>
// kernel: tpu_custom_call.1
= control target key start
LH: loop header
LB: loop body
LE: loop exit
PB: predicated region body
PF: predicated region fallthrough
CT: control target
= control target key end

     0   :  { %vm27_vm0 = vcmask 261120   ;;  %s186_s0 = inlined_call_operand.vmem [shape: f32[8,32], index: 0, kind: input, shape index: {}]   ;;  %s187_s1 = inlined_call_operand.vmem [shape: s32[8,1], index: 1, kind: input, shape index: {}]   ;;  %s188_s2 = inlined_call_operand.hbm [shape: f32[8,128], index: 2, kind: output, shape index: {}]  }
   0x1   :  { %v20_v0 = vld [vmem:[%s186_s0] sm:$0xff] }
   0x2   :  { %7 = vsyncpa [#allocation6], 0  ;;  %v28_v1 = vsel %vm27_vm0, %v20_v0, -inf  ;;  %vm16_vm1 = vcmask 7168   ;;  %v148_v2 = vmov -inf   ;;  %v149_v3 = vmov 0  }
   0x3   :  { %29 = vmax.xlane.f32.xlu0 %v28_v1  ;;  %17 = vst.msk [vmem:[#allocation2] sm:$0xff] %vm16_vm1, %v148_v2  ;;  %115 = vset.pattern.permute.xlu1 %v149_v3  ;;  %v150_v4 = vmov 0.0   ;;  %v21_v5 = vld [vmem:[%s187_s1] sm:$0xff]  ;;  %v22_v10 = vlaneseq  ;;  %s151_s0 = smov [#allocation5]   ;;  %s99_s15 = sshll.u32 %s188_s2, 4  ;;  %s100_s15 = int_to_ptr.hbm [resolvable:$true] %s99_s15 }
   0x4   :  { %114 = vset.pattern.permute.xlu0 %v149_v3  ;;  %18 = vst.msk [vmem:[#allocation3] sm:$0xff] %vm16_vm1, %v150_v4  ;;  %54 = vperm.xlu1 %115, %v21_v5   ;;  %s97_s1 = sshll.u32 %s151_s0, 4  ;;  %s98_s1 = int_to_ptr.vmem [resolvable:$true] %s97_s1 }
   0x5   :  { %19 = vst.msk [vmem:[#allocation4] sm:$0xff] %vm16_vm1, %v150_v4  ;;  %v23_v12 = vand.u32 127, %v22_v10  ;;  %v85_v44 = vshrl.u32 %v22_v10, 7 }
   0x7   :  { %vm86_vm3 = vcmp.eq.s32.totalorder %v85_v44, 0  ;;  %vm87_vm4 = vcmp.eq.s32.totalorder %v23_v12, 0 }
   0x8   :  { %vm88_vm5 = vmand %vm86_vm3, %vm87_vm4 }
   0xa   :  { %v31_v6 = vld [vmem:[#allocation2] sm:$0xff] }
   0xb   :  { %v44_v25 = vld [vmem:[#allocation3] sm:$0xff] }
   0xc   :  { %v57_v20 = vld [vmem:[#allocation4] sm:$0xff] }
  0x76   :  { %v30_v7 = vpop.xlane.xlu0 %29  ;;  %v55_v11 = vpop.permute.xlu1 %54 }
  0x77   :  { %v32_v8 = vmax.f32 %v31_v6, %v30_v7  ;;  %vm56_vm2 = vcmp.eq.s32.totalorder %v23_v12, %v55_v11 }
  0x78   :  { %v58_v13 = vsel %vm56_vm2, %v20_v0, 0.0 }
  0x79   :  { %v33_v9 = vsub.f32 %v31_v6, %v32_v8  ;;  %52 = vst.msk [vmem:[#allocation2] sm:$0xff] %vm16_vm1, %v32_v8  ;;  %38 = vperm.xlu0 %114, %v32_v8   ;;  %v59_v14 = vsel %vm27_vm0, %v58_v13, 0.0 }
  0x7a   :  { %60 = vadd.xlane.f32.xlu2 %v59_v14 }
  0x7b   :  { %v34_v23 = vmul.f32 1.442695, %v33_v9 }
  0x80   :  { %v67_v32 = vld [vmem:[#allocation2] sm:$0xff] }
  0xeb   :  { %v39_v15 = vpop.permute.xlu0 %38 }
  0xec   :  { %v41_v16 = vsub.f32 %v20_v0, %v39_v15 }
  0xed   :  { %v61_v21 = vpop.xlane.xlu2 %60 }
  0xee   :  { %v42_v17 = vmul.f32 1.442695, %v41_v16  ;;  %v62_v22 = vadd.f32 %v61_v21, %v57_v20 }
  0xf0   :  { %116 = vpow2.f32 %v42_v17  ;;  %63 = vst.msk [vmem:[#allocation4] sm:$0xff] %vm16_vm1, %v62_v22 }
  0xf1   :  { %118 = vpow2.f32 %v34_v23 }
  0xf6   :  { %v117_v18 = vpop.eup %116 }
  0xf7   :  { %v46_v19 = vsel %vm27_vm0, %v117_v18, 0.0  ;;  %v119_v24 = vpop.eup %118  ;;  %v72_v33 = vld [vmem:[#allocation4] sm:$0xff] }
  0xf8   :  { %47 = vadd.xlane.f32.xlu1 %v46_v19  ;;  %v45_v26 = vmul.f32 %v119_v24, %v44_v25 }
 0x16b   :  { %v48_v27 = vpop.xlane.xlu1 %47 }
 0x16c   :  { %v49_v28 = vadd.f32 %v48_v27, %v45_v26 }
 0x16e   :  { %51 = vst.msk [vmem:[#allocation3] sm:$0xff] %vm16_vm1, %v49_v28 }
 0x175   :  { %v68_v29 = vld [vmem:[#allocation3] sm:$0xff] }
 0x176   :  { %120 = vlog2.f32 %v68_v29 }
 0x17c   :  { %v121_v30 = vpop.eup %120 }
 0x17d   :  { %v70_v31 = vmul.f32 0.6931472, %v121_v30 }
 0x17f   :  { %v71_v34 = vadd.f32 %v70_v31, %v67_v32 }
 0x181   :  { %v73_v35 = vsub.f32 %v71_v34, %v72_v33 }
 0x183   :  { %v74_v36 = vsel %vm16_vm1, %v73_v35, 0.0 }
 0x184   :  { %75 = vadd.xlane.f32.xlu2 %v74_v36 }
 0x1f7   :  { %v76_v37 = vpop.xlane.xlu2 %75 }
 0x1f8   :  { %v77_v38 = vrot.slane %v76_v37, 4 }
 0x1fa   :  { %v78_v39 = vadd.f32 %v77_v38, %v76_v37 }
 0x1fc   :  { %v79_v40 = vrot.slane %v78_v39, 2 }
 0x1fe   :  { %v80_v41 = vadd.f32 %v79_v40, %v78_v39 }
 0x200   :  { %v81_v42 = vrot.slane %v80_v41, 1 }
 0x202   :  { %v82_v43 = vadd.f32 %v81_v42, %v80_v41 }
 0x204   :  { %108 = vpush %v82_v43 }
 0x235   :  { %s109_s16 = spop %108 }
 0x236   :  { %v89_v45 = vstv %s109_s16 }
 0x237   :  { %v90_v46 = vsel %vm88_vm5, %v89_v45, 0.0 }
 0x238   :  { %91 = vst [vmem:[#allocation5] sm:$0xff] %v90_v46 }
 0x239   :  { %102 = dma.vmem_to_hbm [thread:$0]  %s98_s1, 128, %s100_s15, [#allocation6]  }
 0x23a   :  { %146 = dma.done.wait [#allocation6], 128  }
 0x23b   :  { %147 = vsyncadd [#allocation6], 4294967168 }
 0x23c   :  { %107 = vsyncpa [#allocation6], 1 }

</bundles_post_ra>
